<compile_context>
chip_gen: v5e
topology: v5e:2x2
jax: 0.10.0
libtpu: 0.0.40
codegen_flags: <defaults>
</compile_context>

<pallas_src>
import functools

import jax
import jax.numpy as jnp
from jax.experimental import pallas as pl
from jax.experimental.pallas import tpu as pltpu


def _round_up(v, mult):
    return ((v + mult - 1) // mult) * mult


def _vmem_capacity_bytes():
    """Physical VMEM of the current generation; conservative fallback = v7x."""
    try:
        return int(pltpu.get_tpu_info().vmem_capacity_bytes)
    except Exception:
        return 64 * 1024 * 1024


def _choose_tiles(n_rows, c, m, rinv_itemsize, col_tile=None):
    """Pick (batch_tile, col/reduction_tile, vmem_footprint_bytes)."""
    vmem_cap = _vmem_capacity_bytes()
    budget = int(0.6 * vmem_cap)          # leave headroom for compiler scratch

    if col_tile is not None:
        assert m % col_tile == 0 and (col_tile % 128 == 0 or col_tile == m), (
            "col_tile must divide M and be a multiple of 128 (or equal M)")
        t = col_tile
    elif m % 128 != 0 or 2 * m * m * rinv_itemsize <= budget // 2:
        # Keep chol_inv fully resident (small or lane-unaligned M).
        # TODO(synk): lane-unaligned M that does not fit VMEM would need an
        # in-kernel reduction mask; sparse-grid sizes stay modest in practice.
        t = m
    else:
        # Largest multiple-of-128 divisor of M that is <= 512, so reduction
        # tiles never read past M (no garbage enters the accumulation).
        t = 128
        d = 256
        while d <= min(512, m):
            if m % d == 0:
                t = d
            d += 128

    # Batch tile: 256-512 rows amortizes per-step pipeline overhead and feeds
    # the MXU large LHS tiles; shrink (staying a multiple of 8) only if the
    # double-buffered blocks would overflow the VMEM budget.
    tn = min(512, n_rows)

    def footprint(tn_):
        return (2 * tn_ * c * 4                 # x (double-buffered)
                + 2 * c * t * 4                 # design points (transposed)
                + 2 * t * t * rinv_itemsize     # chol_inv tile
                + 2 * tn_ * t * 4               # output tile
                + tn_ * t * 4)                  # f32 accumulator scratch

    while tn > 8 and footprint(tn) > budget:
        tn = max(8, _round_up(tn // 2, 8))
    return tn, t, footprint(tn)


def _tmk_kernel(x_ref, dp_ref, rinv_ref, o_ref, acc_ref, *,
                n_features, neg_inv_ls, nk, skip_lower):
    """One (batch-tile, out-col-tile, reduction-tile) grid step.

    x_ref    : [TN, C]   input rows for this batch tile
    dp_ref   : [C,  T]   design points (feature-major) for this reduction tile
    rinv_ref : [T,  T]   chol_inv block (rows = reduction, cols = output)
    o_ref    : [TN, T]   output tile
    acc_ref  : [TN, T]   f32 accumulator, persistent across the reduction axis
    """
    j = pl.program_id(1)   # output-column tile
    k = pl.program_id(2)   # reduction (design-point) tile

    @pl.when(k == 0)
    def _init():
        acc_ref[...] = jnp.zeros_like(acc_ref)

    def _accumulate():
        x = x_ref[...]             # (TN, C) f32
        dp = dp_ref[...]           # (C,  T) f32
        tn = x.shape[0]
        t = dp.shape[1]
        # L1 distance accumulated feature-by-feature (C is small for
        # sparse-grid designs, so a full unroll keeps vreg pressure bounded).
        # TODO(synk): for large C switch to lax.fori_loop(..., unroll=2..4).
        dist = jnp.zeros((tn, t), jnp.float32)
        for c in range(n_features):
            xc = x[:, c:c + 1]        # (TN, 1) broadcast along lanes
            dc = dp[c:c + 1, :]       # (1,  T) broadcast along sublanes
            dist = dist + jnp.abs(xc - dc)
        # Laplace product kernel; -1/lengthscale baked at trace time.
        kmat = jnp.exp(dist * neg_inv_ls)
        rhs = rinv_ref[...]
        # MXU matmul; operands in rhs dtype (f32 or bf16), f32 accumulation.
        acc_ref[...] += jnp.dot(kmat.astype(rhs.dtype), rhs,
                                preferred_element_type=jnp.float32)

    if skip_lower:
        # chol_inv is upper-triangular: blocks strictly below the diagonal are
        # all-zero, so their distance/exp/matmul work can be skipped.
        pl.when(k <= j)(_accumulate)
    else:
        _accumulate()

    @pl.when(k == nk - 1)
    def _store():
        o_ref[...] = acc_ref[...].astype(o_ref.dtype)


def tmk_forward(x, design_points, chol_inv, lengthscale=1.0, *,
                mxu_dtype=jnp.float32, chol_inv_is_upper=True, col_tile=None):
    """out = LaplaceProductKernel(x, design_points) @ chol_inv  (Pallas, TPU).

    mxu_dtype=jnp.bfloat16 runs the matmul with bf16 operands (f32 accumulate)
    for 2-3x MXU throughput and half the chol_inv DMA/VMEM; validate against
    the application's tolerance before enabling.
    """
    n, c = x.shape
    m = design_points.shape[0]

    x = x.astype(jnp.float32)
    dp_t = design_points.T.astype(jnp.float32)     # [C, M] feature-major (glue)
    rinv = chol_inv.astype(mxu_dtype)

    # Pad the batch only to the next multiple of 8 (sublane); partial last grid
    # blocks are masked by Pallas, so no padding to the tile size is needed.
    n_eff = _round_up(n, 8)
    if n_eff != n:
        x = jnp.pad(x, ((0, n_eff - n), (0, 0)))

    rinv_itemsize = jnp.dtype(mxu_dtype).itemsize
    tn, t, footprint = _choose_tiles(n_eff, c, m, rinv_itemsize, col_tile)

    grid = (pl.cdiv(n_eff, tn), m // t, m // t)    # t always divides m
    nb, nj, nk = grid

    kernel = functools.partial(
        _tmk_kernel,
        n_features=c,
        neg_inv_ls=-1.0 / float(lengthscale),
        nk=nk,
        skip_lower=bool(chol_inv_is_upper) and nk > 1)

    vmem_cap = _vmem_capacity_bytes()
    vmem_limit = int(min(0.9 * vmem_cap, max(32 << 20, 2 * footprint)))

    cost = pl.CostEstimate(
        flops=2 * n_eff * m * m + 3 * n_eff * m * c * nj,
        transcendentals=n_eff * m * nj,
        bytes_accessed=(4 * n_eff * c + 4 * c * m * nj
                        + rinv_itemsize * m * m * nb + 4 * n_eff * m),
    )

    out = pl.pallas_call(
        kernel,
        out_shape=jax.ShapeDtypeStruct((n_eff, m), jnp.float32),
        grid_spec=pltpu.PrefetchScalarGridSpec(
            num_scalar_prefetch=0,
            grid=grid,
            in_specs=[
                pl.BlockSpec((tn, c), lambda i, j, k: (i, 0)),   # x rows
                pl.BlockSpec((c, t), lambda i, j, k: (0, k)),    # design pts
                pl.BlockSpec((t, t), lambda i, j, k: (k, j)),    # chol_inv
            ],
            out_specs=pl.BlockSpec((tn, t), lambda i, j, k: (i, j)),
            scratch_shapes=[pltpu.VMEM((tn, t), jnp.float32)],
        ),
        compiler_params=pltpu.CompilerParams(
            # TODO(synk): on v7x use pltpu.CORE_PARALLEL on the batch axis to
            # shard across its 2 TensorCores; "parallel" is safe everywhere.
            dimension_semantics=("parallel", "parallel", "arbitrary"),
            vmem_limit_bytes=vmem_limit,
        ),
        cost_estimate=cost,
    )(x, dp_t, rinv)

    return out[:n] if n_eff != n else out


def tmk_reference(x, design_points, chol_inv, lengthscale=1.0):
    """Pure-JAX reference of the TMK forward."""
    dist = jnp.sum(jnp.abs(x[:, None, :] - design_points[None, :, :]), axis=-1)
    k = jnp.exp(-dist / lengthscale)
    return k @ chol_inv


def make_tmk_params(key, in_features, n_points, input_lb=-2.0, input_ub=2.0,
                    lengthscale=1.0):
    """Deterministic synthetic stand-in for the sparse-grid __init__ buffers.

    Returns (design_points [M, C], chol_inv [M, M]) where chol_inv = R^{-1},
    R upper-triangular with K(design, design) = R^T R (plus small jitter).
    """
    # TODO(synk): real module builds design points via SparseGridDesign /
    # HyperbolicCrossDesign; here they are a deterministic pseudo-random grid.
    design_points = jax.random.uniform(
        key, (n_points, in_features), jnp.float32,
        minval=input_lb, maxval=input_ub)

    dist = jnp.sum(
        jnp.abs(design_points[:, None, :] - design_points[None, :, :]), axis=-1)
    k_dd = (jnp.exp(-dist / lengthscale)
            + 1e-3 * jnp.eye(n_points, dtype=jnp.float32))

    chol_lower = jnp.linalg.cholesky(k_dd)                 # K = L L^T
    r_upper = chol_lower.T                                 # K = R^T R
    r_inv = jax.scipy.linalg.solve_triangular(
        r_upper, jnp.eye(n_points, dtype=jnp.float32), lower=False)
    return design_points, r_inv.astype(jnp.float32)


if __name__ == "__main__":
    key = jax.random.PRNGKey(0)
    k1, k2, k3, k4 = jax.random.split(key, 4)

    # Case 1: small shapes (N=8, C=4, M=128), fully resident chol_inv, f32 MXU.
    N, C, M = 8, 4, 128
    x = jax.random.normal(k1, (N, C), jnp.float32)
    design_points, chol_inv = make_tmk_params(k2, in_features=C, n_points=M)

    out = jax.block_until_ready(tmk_forward(x, design_points, chol_inv))
    ref = tmk_reference(x, design_points, chol_inv)
    assert out.shape == (N, M)
    assert jnp.allclose(out, ref, rtol=1e-2, atol=1e-3), (
        f"f32 resident path: max abs diff {jnp.max(jnp.abs(out - ref))}")

    # Case 2: same inputs, bf16 MXU operands with f32 accumulation (loose gate:
    # bf16 operand rounding through chol_inv can amplify; this is a sanity
    # check that the fast path is healthy, not a bit-accuracy claim).
    out_bf16 = jax.block_until_ready(
        tmk_forward(x, design_points, chol_inv, mxu_dtype=jnp.bfloat16))
    bf16_err = float(jnp.max(jnp.abs(out_bf16 - ref)))
    assert bool(jnp.isfinite(out_bf16).all()) and bf16_err < 0.25, (
        f"bf16 MXU path looks broken: max abs diff {bf16_err}")

    # Case 3: batch-tiled grid with a partial last batch block (N=531 -> pad to
    # 536, 512-row tiles) plus column/reduction tiling of the matmul with the
    # upper-triangular block skip (col_tile forced to 128 to exercise it).
    N2, C2, M2 = 531, 4, 256
    x2 = jax.random.normal(k3, (N2, C2), jnp.float32)
    dp2, rinv2 = make_tmk_params(k4, in_features=C2, n_points=M2)

    out2 = jax.block_until_ready(tmk_forward(x2, dp2, rinv2, col_tile=128))
    ref2 = tmk_reference(x2, dp2, rinv2)
    assert out2.shape == (N2, M2)
    assert jnp.allclose(out2, ref2, rtol=1e-2, atol=1e-3), (
        f"tiled path: max abs diff {jnp.max(jnp.abs(out2 - ref2))}")

    print("KERNEL_OK")
</pallas_src>

<mosaic_0001>
module attributes {stable_mosaic.version = 11 : i64} {
  func.func @_tmk_kernel(%arg0: i32, %arg1: i32, %arg2: i32, %arg3: memref<8x4xf32, #tpu.memory_space<vmem>>, %arg4: memref<4x128xf32, #tpu.memory_space<vmem>>, %arg5: memref<128x128xf32, #tpu.memory_space<vmem>>, %arg6: memref<8x128xf32, #tpu.memory_space<vmem>>, %arg7: memref<8x128xf32, #tpu.memory_space<vmem>>) attributes {dimension_semantics = [#tpu.dimension_semantics<parallel>, #tpu.dimension_semantics<parallel>, #tpu.dimension_semantics<arbitrary>], iteration_bounds = array<i64: 1, 1, 1>, scalar_prefetch = 0 : i64, scratch_operands = 1 : i64, tpu.core_type = #tpu.core_type<tc>, window_params = [{transform_indices = @transform_0, window_bounds = array<i64: 8, 4>}, {transform_indices = @transform_1, window_bounds = array<i64: 4, 128>}, {transform_indices = @transform_2, window_bounds = array<i64: 128, 128>}, {transform_indices = @transform_3, window_bounds = array<i64: 8, 128>}]} {
    %c0_i32 = arith.constant 0 : i32
    %0 = arith.cmpi eq, %arg2, %c0_i32 : i32
    %1 = arith.extui %0 : i1 to i32
    %c0_i32_0 = arith.constant 0 : i32
    %2 = arith.cmpi ne, %1, %c0_i32_0 : i32
    scf.if %2 {
      %cst_14 = arith.constant 0.000000e+00 : f32
      %45 = vector.broadcast %cst_14 : f32 to vector<8x128xf32>
      %c0_15 = arith.constant 0 : index
      %c0_16 = arith.constant 0 : index
      %46 = vector.load %arg7[%c0_15, %c0_16] : memref<8x128xf32, #tpu.memory_space<vmem>>, vector<8x128xf32>
      tpu.vector_store %arg7[%c0_15, %c0_16], %45 {strides = array<i32>} : memref<8x128xf32, #tpu.memory_space<vmem>>, vector<8x128xf32>,
    } else {
    }
    %c0 = arith.constant 0 : index
    %c0_1 = arith.constant 0 : index
    %3 = vector.load %arg3[%c0, %c0_1] : memref<8x4xf32, #tpu.memory_space<vmem>>, vector<8x4xf32>
    %c0_2 = arith.constant 0 : index
    %c0_3 = arith.constant 0 : index
    %4 = vector.load %arg4[%c0_2, %c0_3] : memref<4x128xf32, #tpu.memory_space<vmem>>, vector<4x128xf32>
    %cst = arith.constant 0.000000e+00 : f32
    %5 = vector.broadcast %cst : f32 to vector<8x128xf32>
    %6 = vector.extract_strided_slice %3 {offsets = [0, 0], sizes = [8, 1], strides = [1, 1]} : vector<8x4xf32> to vector<8x1xf32>
    %7 = vector.extract_strided_slice %4 {offsets = [0, 0], sizes = [1, 128], strides = [1, 1]} : vector<4x128xf32> to vector<1x128xf32>
    %8 = vector.broadcast %6 : vector<8x1xf32> to vector<8x128xf32>
    %9 = vector.broadcast %7 : vector<1x128xf32> to vector<8x128xf32>
    %10 = arith.subf %8, %9 : vector<8x128xf32>
    %11 = math.absf %10 : vector<8x128xf32>
    %12 = arith.addf %5, %11 : vector<8x128xf32>
    %13 = vector.extract_strided_slice %3 {offsets = [0, 1], sizes = [8, 1], strides = [1, 1]} : vector<8x4xf32> to vector<8x1xf32>
    %14 = vector.extract_strided_slice %4 {offsets = [1, 0], sizes = [1, 128], strides = [1, 1]} : vector<4x128xf32> to vector<1x128xf32>
    %15 = vector.broadcast %13 : vector<8x1xf32> to vector<8x128xf32>
    %16 = vector.broadcast %14 : vector<1x128xf32> to vector<8x128xf32>
    %17 = arith.subf %15, %16 : vector<8x128xf32>
    %18 = math.absf %17 : vector<8x128xf32>
    %19 = arith.addf %12, %18 : vector<8x128xf32>
    %20 = vector.extract_strided_slice %3 {offsets = [0, 2], sizes = [8, 1], strides = [1, 1]} : vector<8x4xf32> to vector<8x1xf32>
    %21 = vector.extract_strided_slice %4 {offsets = [2, 0], sizes = [1, 128], strides = [1, 1]} : vector<4x128xf32> to vector<1x128xf32>
    %22 = vector.broadcast %20 : vector<8x1xf32> to vector<8x128xf32>
    %23 = vector.broadcast %21 : vector<1x128xf32> to vector<8x128xf32>
    %24 = arith.subf %22, %23 : vector<8x128xf32>
    %25 = math.absf %24 : vector<8x128xf32>
    %26 = arith.addf %19, %25 : vector<8x128xf32>
    %27 = vector.extract_strided_slice %3 {offsets = [0, 3], sizes = [8, 1], strides = [1, 1]} : vector<8x4xf32> to vector<8x1xf32>
    %28 = vector.extract_strided_slice %4 {offsets = [3, 0], sizes = [1, 128], strides = [1, 1]} : vector<4x128xf32> to vector<1x128xf32>
    %29 = vector.broadcast %27 : vector<8x1xf32> to vector<8x128xf32>
    %30 = vector.broadcast %28 : vector<1x128xf32> to vector<8x128xf32>
    %31 = arith.subf %29, %30 : vector<8x128xf32>
    %32 = math.absf %31 : vector<8x128xf32>
    %33 = arith.addf %26, %32 : vector<8x128xf32>
    %cst_4 = arith.constant -1.000000e+00 : f32
    %34 = vector.broadcast %cst_4 : f32 to vector<8x128xf32>
    %35 = arith.mulf %33, %34 : vector<8x128xf32>
    %36 = math.exp %35 : vector<8x128xf32>
    %c0_5 = arith.constant 0 : index
    %c0_6 = arith.constant 0 : index
    %37 = vector.load %arg5[%c0_5, %c0_6] : memref<128x128xf32, #tpu.memory_space<vmem>>, vector<128x128xf32>
    %c0_7 = arith.constant 0 : index
    %c0_8 = arith.constant 0 : index
    %38 = vector.load %arg7[%c0_7, %c0_8] : memref<8x128xf32, #tpu.memory_space<vmem>>, vector<8x128xf32>
    %cst_9 = arith.constant dense<0.000000e+00> : vector<8x128xf32>
    %39 = tpu.matmul %36, %37, %cst_9 {dimension_numbers = #tpu.dot_dimension_numbers<[1], [0], [0], [1], [0, 0, 1, 1], [], []>} : vector<8x128xf32>, vector<128x128xf32>, vector<8x128xf32> -> vector<8x128xf32>
    %40 = arith.addf %38, %39 : vector<8x128xf32>
    %c0_10 = arith.constant 0 : index
    %c0_11 = arith.constant 0 : index
    %41 = vector.load %arg7[%c0_10, %c0_11] : memref<8x128xf32, #tpu.memory_space<vmem>>, vector<8x128xf32>
    tpu.vector_store %arg7[%c0_10, %c0_11], %40 {strides = array<i32>} : memref<8x128xf32, #tpu.memory_space<vmem>>, vector<8x128xf32>,
    %c0_i32_12 = arith.constant 0 : i32
    %42 = arith.cmpi eq, %arg2, %c0_i32_12 : i32
    %43 = arith.extui %42 : i1 to i32
    %c0_i32_13 = arith.constant 0 : i32
    %44 = arith.cmpi ne, %43, %c0_i32_13 : i32
    scf.if %44 {
      %c0_14 = arith.constant 0 : index
      %c0_15 = arith.constant 0 : index
      %45 = vector.load %arg7[%c0_14, %c0_15] : memref<8x128xf32, #tpu.memory_space<vmem>>, vector<8x128xf32>
      %c0_16 = arith.constant 0 : index
      %c0_17 = arith.constant 0 : index
      %46 = vector.load %arg6[%c0_16, %c0_17] : memref<8x128xf32, #tpu.memory_space<vmem>>, vector<8x128xf32>
      tpu.vector_store %arg6[%c0_16, %c0_17], %45 {strides = array<i32>} : memref<8x128xf32, #tpu.memory_space<vmem>>, vector<8x128xf32>,
    } else {
    }
    return
  }
  func.func @transform_0(%arg0: i32, %arg1: i32, %arg2: i32) -> (i32, i32) {
    %c0_i32 = arith.constant 0 : i32
    %c0_i32_0 = arith.constant 0 : i32
    return %arg0, %c0_i32 : i32, i32
  }
  func.func @transform_1(%arg0: i32, %arg1: i32, %arg2: i32) -> (i32, i32) {
    %c0_i32 = arith.constant 0 : i32
    %c0_i32_0 = arith.constant 0 : i32
    return %c0_i32, %arg2 : i32, i32
  }
  func.func @transform_2(%arg0: i32, %arg1: i32, %arg2: i32) -> (i32, i32) {
    %c0_i32 = arith.constant 0 : i32
    return %arg2, %arg1 : i32, i32
  }
  func.func @transform_3(%arg0: i32, %arg1: i32, %arg2: i32) -> (i32, i32) {
    %c0_i32 = arith.constant 0 : i32
    return %arg0, %arg1 : i32, i32
  }
}

</mosaic_0001>

<bundles_post_ra>
// kernel: tpu_custom_call.1
= control target key start
LH: loop header
LB: loop body
LE: loop exit
PB: predicated region body
PF: predicated region fallthrough
CT: control target
= control target key end

     0   :  { %8 = vsyncpa [#allocation4], 0  ;;  %s242_s0 = inlined_call_operand.vmem [shape: f32[8,4], index: 0, kind: input, shape index: {}]   ;;  %s243_s1 = inlined_call_operand.vmem [shape: f32[4,128], index: 1, kind: input, shape index: {}]   ;;  %s244_s2 = inlined_call_operand.hbm [shape: f32[128,128], index: 2, kind: input, shape index: {}]   ;;  %s245_s3 = inlined_call_operand.hbm [shape: f32[8,128], index: 3, kind: output, shape index: {}]  }
   0x1   :  { %9 = vsyncpa [#allocation5], 0  ;;  %s18_s14 = sshll.u32 %s244_s2, 4  ;;  %s202_s15 = smov [#allocation3]   ;;  %s19_s14 = int_to_ptr.hbm [resolvable:$true] %s18_s14 }
   0x2   :  { %s20_s16 = sshll.u32 %s202_s15, 4  ;;  %s203_s17 = smov 128   ;;  %s21_s16 = int_to_ptr.vmem [resolvable:$true] %s20_s16 }
   0x3   :  { %s204_s18 = smov 8  }
   0x4   :  { %26 = dma.hbm_to_vmem [thread:$0]  %s19_s14, 2048, %s21_s16, [#allocation4], %s203_s17, %s203_s17, %s204_s18  }
   0x5   :  { %198 = dma.done.wait [#allocation4], 2048  }
   0x6   :  { %199 = vsyncadd [#allocation4], 4294965248  ;;  %v205_v0 = vmov 0   ;;  %v206_v1 = vmov 2   ;;  %v36_v2 = vld [vmem:[%s242_s0] sm:$0xff]  ;;  %v89_v3 = vld [vmem:[#allocation3 + $0x78] sm:$0xff] }
   0x7   :  { %143 = vset.pattern.permute.xlu0 %v205_v0  ;;  %145 = vset.pattern.permute.xlu1 %v206_v1  ;;  %v207_v4 = vmov 1   ;;  %v208_v5 = vmov 3   ;;  %v88_v6 = vld [vmem:[#allocation3 + $0x70] sm:$0xff]  ;;  %v87_v7 = vld [vmem:[#allocation3 + $0x68] sm:$0xff]  ;;  %v86_v8 = vld [vmem:[#allocation3 + $0x60] sm:$0xff]  ;;  %s125_s24 = sshll.u32 %s245_s3, 4  ;;  %s126_s24 = int_to_ptr.hbm [resolvable:$true] %s125_s24 }
   0x8   :  { %40 = vperm.xlu0 %143, %v36_v2   ;;  %56 = vperm.xlu1 %145, %v36_v2   ;;  %v85_v9 = vld [vmem:[#allocation3 + $0x58] sm:$0xff]  ;;  %v84_v10 = vld [vmem:[#allocation3 + $0x50] sm:$0xff]  ;;  %v83_v11 = vld [vmem:[#allocation3 + $0x48] sm:$0xff] }
   0x9   :  { %91 = vmatpush.msra.mxu0 %v89_v3  ;;  %v82_v12 = vld [vmem:[#allocation3 + $0x40] sm:$0xff]  ;;  %v81_v13 = vld [vmem:[#allocation3 + $0x38] sm:$0xff]  ;;  %v80_v14 = vld [vmem:[#allocation3 + $0x30] sm:$0xff] }
   0xa   :  { %v79_v15 = vld [vmem:[#allocation3 + $0x28] sm:$0xff]  ;;  %v78_v16 = vld [vmem:[#allocation3 + $0x20] sm:$0xff]  ;;  %v77_v17 = vld [vmem:[#allocation3 + $0x18] sm:$0xff] }
   0xb   :  { %92 = vmatpush.msra.mxu0 %v88_v6  ;;  %v76_v18 = vld [vmem:[#allocation3 + $0x10] sm:$0xff]  ;;  %v75_v19 = vld [vmem:[#allocation3 + $0x8] sm:$0xff]  ;;  %v74_v20 = vld [vmem:[#allocation3] sm:$0xff] }
   0xc   :  { %v37_v23 = vld [vmem:[%s243_s1] sm:$0xf]  ;;  %s209_s1 = smov [#allocation6]  }
   0xd   :  { %93 = vmatpush.msra.mxu0 %v87_v7  ;;  %v43_v24 = vperm.slane %v37_v23, 0  ;;  %v59_v25 = vperm.slane %v37_v23, 2  ;;  %v51_v26 = vperm.slane %v37_v23, 1  ;;  %v67_v27 = vperm.slane %v37_v23, 3  ;;  %s123_s21 = sshll.u32 %s209_s1, 4  ;;  %s124_s21 = int_to_ptr.vmem [resolvable:$true] %s123_s21 }
   0xf   :  { %94 = vmatpush.msra.mxu0 %v86_v8 }
  0x10   :  { %144 = vset.pattern.permute.xlu0 %v207_v4  ;;  %146 = vset.pattern.permute.xlu1 %v208_v5 }
  0x11   :  { %48 = vperm.xlu0 %144, %v36_v2   ;;  %64 = vperm.xlu1 %146, %v36_v2  }
  0x12   :  { %95 = vmatpush.msra.mxu0 %v85_v9 }
  0x14   :  { %96 = vmatpush.msra.mxu0 %v84_v10 }
  0x16   :  { %97 = vmatpush.msra.mxu0 %v83_v11 }
  0x18   :  { %98 = vmatpush.msra.mxu0 %v82_v12 }
  0x19   :  { %147 = vset.pattern.permute.xlu0 %v208_v5 }
  0x1a   :  { %99 = vmatpush.msra.mxu0 %v81_v13 }
  0x1c   :  { %100 = vmatpush.msra.mxu0 %v80_v14 }
  0x1e   :  { %101 = vmatpush.msra.mxu0 %v79_v15 }
  0x20   :  { %102 = vmatpush.msra.mxu0 %v78_v16 }
  0x22   :  { %103 = vmatpush.msra.mxu0 %v77_v17 }
  0x24   :  { %104 = vmatpush.msra.mxu0 %v76_v18 }
  0x26   :  { %105 = vmatpush.msra.mxu0 %v75_v19 }
  0x28   :  { %106 = vmatpush.msra.mxu0 %v74_v20 }
  0x7a   :  { %v41_v21 = vpop.permute.xlu0 %40  ;;  %v57_v22 = vpop.permute.xlu1 %56 }
  0x7b   :  { %v44_v28 = vsub.f32 %v41_v21, %v43_v24  ;;  %v60_v31 = vsub.f32 %v57_v22, %v59_v25 }
  0x7d   :  { %v45_v34 = vand.u32 2147483647, %v44_v28  ;;  %v61_v36 = vand.u32 2147483647, %v60_v31 }
  0x83   :  { %v49_v29 = vpop.permute.xlu0 %48  ;;  %v65_v30 = vpop.permute.xlu1 %64 }
  0x84   :  { %v52_v32 = vsub.f32 %v49_v29, %v51_v26  ;;  %v68_v33 = vsub.f32 %v65_v30, %v67_v27 }
  0x86   :  { %v53_v35 = vand.u32 2147483647, %v52_v32  ;;  %v69_v38 = vand.u32 2147483647, %v68_v33 }
  0x88   :  { %v54_v37 = vadd.f32 %v53_v35, %v45_v34 }
  0x8a   :  { %v62_v39 = vadd.f32 %v61_v36, %v54_v37 }
  0x8c   :  { %v70_v40 = vadd.f32 %v69_v38, %v62_v39 }
  0x8e   :  { %v71_v41 = vmul.f32 -1.0, %v70_v40 }
  0x90   :  { %v72_v42 = vmul.f32 1.442695, %v71_v41 }
  0x92   :  { %148 = vpow2.f32 %v72_v42 }
  0x98   :  { %v149_v43 = vpop.eup %148 }
  0x99   :  { %107 = vmatmul.f32.vlgmr.msra.gmra.mxu0 %v149_v43 }
 0x116   :  { %v108_v44 = vpop.f32.mrf.mxu0 }
 0x117   :  { %117 = vst [vmem:[#allocation6] sm:$0xff] %v108_v44 }
 0x118   :  { %128 = dma.vmem_to_hbm [thread:$0]  %s124_s21, 128, %s126_s24, [#allocation5]  }
 0x119   :  { %200 = dma.done.wait [#allocation5], 128  }
 0x11a   :  { %201 = vsyncadd [#allocation5], 4294967168 }
 0x11b   :  { %133 = vsyncpa [#allocation4], 1 }
 0x11c   :  { %134 = vsyncpa [#allocation5], 1 }

</bundles_post_ra>
